<compile_context>
chip_gen: v5e
topology: v5e:2x2
jax: 0.10.0
libtpu: 0.0.40
codegen_flags: <defaults>
</compile_context>

<pallas_src>
import jax
import jax.numpy as jnp
from jax.experimental import pallas as pl
from jax.experimental.pallas import tpu as pltpu


def _round_up(a, b):
    return -(-a // b) * b


def _sublane_align(dtype):
    # f32 -> 8, bf16 -> 16, int8/fp8 -> 32 (sublane packing of the (8,128) vreg).
    return max(8, 32 // jnp.dtype(dtype).itemsize)


def _lane_group(e, cap=8):
    """Smallest g (<= cap) with (g*e) % 128 == 0 so the grouped output row is
    an exact multiple of the 128-lane vreg; fallback: at least fill 128 lanes."""
    for g in range(1, cap + 1):
        if (g * e) % 128 == 0:
            return g
    return min(cap, max(1, -(-128 // e)))


def _pick_rows_tile(m2, cap_rows, align):
    """Tile (in grouped rows) for the M axis.

    - multiple of the dtype sublane alignment,
    - as large as the VMEM cap allows,
    - even number of >= 2 tiles whenever m2 allows (v7x: 2 TensorCores share
      the "parallel" grid axis),
    - no divisor search (avoids degenerate tiny tiles); the ragged final tile
      is handled by Pallas' masked edge blocks.
    """
    cap = max(align, cap_rows - cap_rows % align)
    if m2 <= align:
        return align
    n_pairs = -(-m2 // (2 * cap))          # ceil
    n_tiles = 2 * n_pairs                  # even tile count
    t = _round_up(-(-m2 // n_tiles), align)
    return min(max(t, align), cap)


def patch_embed_kernel(x_ref, w_ref, b_ref, o_ref):
    # x_ref: (TM2, g*K) grouped patch tile (pipelined).
    # w_ref: (g*K, g*E) block-diagonal weight, VMEM-resident across all steps.
    # b_ref: (1, g*E) f32 bias (tiled g times), VMEM-resident.
    acc = jnp.dot(x_ref[...], w_ref[...], preferred_element_type=jnp.float32)
    o_ref[...] = (acc + b_ref[...]).astype(o_ref.dtype)


def patch_embed_2d(x, weight, bias, patch_size, *, m_tile_cap=16384,
                   lane_group_cap=8):
    """x: (B, C, H, W); weight: (E, C, ph, pw); bias: (E,) -> (B, H//ph, W//pw, E)."""
    if isinstance(patch_size, int):
        ph, pw = patch_size, patch_size
    else:
        ph, pw = patch_size
    B, C, H, W = x.shape
    E = weight.shape[0]
    Hp, Wp = H // ph, W // pw

    # Conv2d with stride == kernel (VALID) drops trailing rows/cols.
    if H != Hp * ph or W != Wp * pw:
        x = x[:, :, : Hp * ph, : Wp * pw]

    M = B * Hp * Wp
    K = C * ph * pw

    # im2col: (B, C, H, W) -> (M, K); K flattened in (c, kh, kw) order to match
    # the PyTorch Conv2d weight layout (E, C, ph, pw).  One XLA copy of the
    # activations (see TODO about fusing this into the kernel).
    patches = x.reshape(B, C, Hp, ph, Wp, pw)
    patches = patches.transpose(0, 2, 4, 1, 3, 5).reshape(M, K)

    # Lane-dense grouping: fold g consecutive output rows into one row of width
    # g*E.  LHS view (M/g, g*K) is a free row-major reshape; the weight becomes
    # block-diagonal kron(I_g, W) so a single plain 2-D MXU dot produces the
    # grouped output directly (no in-kernel relayout).
    g = _lane_group(E, lane_group_cap)
    if M % g:  # rare (only when Wp is not a multiple of g); tiny pad-to-group.
        patches = jnp.pad(patches, ((0, g - M % g), (0, 0)))
    M2 = patches.shape[0] // g
    gK, gE = g * K, g * E
    lhs = patches.reshape(M2, gK)

    w2d = weight.reshape(E, K).T.astype(x.dtype)                   # (K, E)
    wg = jnp.kron(jnp.eye(g, dtype=w2d.dtype), w2d)                # (g*K, g*E)
    bg = jnp.tile(bias.astype(jnp.float32), g).reshape(1, gE)      # f32 epilogue

    align = _sublane_align(x.dtype)
    tm2 = _pick_rows_tile(M2, max(1, m_tile_cap // g), align)
    grid = (pl.cdiv(M2, tm2),)
    m2p = grid[0] * tm2

    item = jnp.dtype(x.dtype).itemsize
    # Double-buffered LHS + out tiles, plus the resident (double-buffered)
    # weight/bias.  Default tiling needs ~20 MiB; raise the scoped-VMEM limit
    # (v5e default is 16 MiB) but stay under v7x's 64 MiB physical VMEM.
    buf_bytes = 2 * tm2 * (gK + gE) * item + 2 * gK * gE * item + 2 * gE * 4
    vmem_limit = int(min(48 * 2**20, max(24 * 2**20, 1.25 * buf_bytes + (2 << 20))))

    cost = pl.CostEstimate(
        flops=2 * m2p * gK * gE,
        transcendentals=0,
        bytes_accessed=(m2p * gK * item + gK * gE * item + gE * 4
                        + m2p * gE * item),
    )

    out2 = pl.pallas_call(
        patch_embed_kernel,
        out_shape=jax.ShapeDtypeStruct((M2, gE), x.dtype),
        grid_spec=pltpu.PrefetchScalarGridSpec(
            num_scalar_prefetch=0,
            grid=grid,
            in_specs=[
                pl.BlockSpec((tm2, gK), lambda i: (i, 0)),   # patch tile (pipelined)
                pl.BlockSpec((gK, gE), lambda i: (0, 0)),    # weight: fetched once
                pl.BlockSpec((1, gE), lambda i: (0, 0)),     # bias:   fetched once
            ],
            out_specs=pl.BlockSpec((tm2, gE), lambda i: (i, 0)),
        ),
        compiler_params=pltpu.CompilerParams(
            # Independent M tiles -> shard across both TensorCores on v7x.
            dimension_semantics=("parallel",),
            vmem_limit_bytes=vmem_limit,
        ),
        cost_estimate=cost,
    )(lhs, wg, bg)

    # Ungroup (free reshape), drop pad-to-g rows, restore (B, Hp, Wp, E).
    out = out2.reshape(M2 * g, E)[:M].reshape(B, Hp, Wp, E)
    return out


def _reference(x, weight, bias, p):
    ref = jax.lax.conv_general_dilated(
        x, weight, window_strides=(p, p), padding="VALID",
        dimension_numbers=("NCHW", "OIHW", "NCHW"))
    return jnp.transpose(ref + bias[None, :, None, None], (0, 2, 3, 1))


if __name__ == "__main__":
    key = jax.random.PRNGKey(0)

    # --- Check 1: patch_size=4, in_chans=4, embed_dim=32, 16x16 image, batch 2.
    #     Single-tile, exactly divisible path (g=4 -> 128-lane output). ---
    B, C, H, W, p, E = 2, 4, 16, 16, 4, 32
    kx, kw, kb = jax.random.split(key, 3)
    x = jax.random.normal(kx, (B, C, H, W), dtype=jnp.float32)
    weight = jax.random.normal(kw, (E, C, p, p), dtype=jnp.float32) * 0.02
    bias = jax.random.normal(kb, (E,), dtype=jnp.float32) * 0.02

    out = jax.block_until_ready(patch_embed_2d(x, weight, bias, p))
    ref = _reference(x, weight, bias, p)
    assert out.shape == (B, H // p, W // p, E), out.shape
    assert jnp.allclose(out, ref, atol=1e-5, rtol=1e-5), \
        float(jnp.max(jnp.abs(out - ref)))

    # --- Check 2: module defaults (in_chans=3, embed_dim=96), non-divisible
    #     spatial dims (truncation), M % g != 0 (pad-to-group path) and a small
    #     tile cap so the multi-step pipelined grid + ragged masked final tile
    #     are exercised (g=4 -> 384-lane output). ---
    B2, C2, H2, W2, E2 = 2, 3, 38, 37, 96
    k2 = jax.random.split(kb, 3)
    x2 = jax.random.normal(k2[0], (B2, C2, H2, W2), dtype=jnp.float32)
    w2 = jax.random.normal(k2[1], (E2, C2, p, p), dtype=jnp.float32) * 0.02
    b2 = jax.random.normal(k2[2], (E2,), dtype=jnp.float32) * 0.02

    out2 = jax.block_until_ready(patch_embed_2d(x2, w2, b2, p, m_tile_cap=32))
    ref2 = _reference(x2, w2, b2, p)
    assert out2.shape == (B2, H2 // p, W2 // p, E2), out2.shape
    assert jnp.allclose(out2, ref2, atol=1e-4, rtol=1e-4), \
        float(jnp.max(jnp.abs(out2 - ref2)))

    print("KERNEL_OK")
</pallas_src>

<mosaic_0001>
module attributes {stable_mosaic.version = 11 : i64} {
  func.func @patch_embed_kernel(%arg0: i32, %arg1: memref<8x256xf32, #tpu.memory_space<vmem>>, %arg2: memref<256x128xf32, #tpu.memory_space<vmem>>, %arg3: memref<1x128xf32, #tpu.memory_space<vmem>>, %arg4: memref<8x128xf32, #tpu.memory_space<vmem>>) attributes {dimension_semantics = [#tpu.dimension_semantics<parallel>], iteration_bounds = array<i64: 1>, scalar_prefetch = 0 : i64, scratch_operands = 0 : i64, tpu.core_type = #tpu.core_type<tc>, window_params = [{transform_indices = @transform_0, window_bounds = array<i64: 8, 256>}, {pipeline_mode = #tpu.pipeline_mode<synchronous>, transform_indices = @transform_1, window_bounds = array<i64: 256, 128>}, {pipeline_mode = #tpu.pipeline_mode<synchronous>, transform_indices = @transform_2, window_bounds = array<i64: 1, 128>}, {transform_indices = @transform_3, window_bounds = array<i64: 8, 128>}]} {
    %c0 = arith.constant 0 : index
    %c0_0 = arith.constant 0 : index
    %0 = vector.load %arg1[%c0, %c0_0] : memref<8x256xf32, #tpu.memory_space<vmem>>, vector<8x256xf32>
    %c0_1 = arith.constant 0 : index
    %c0_2 = arith.constant 0 : index
    %1 = vector.load %arg2[%c0_1, %c0_2] : memref<256x128xf32, #tpu.memory_space<vmem>>, vector<256x128xf32>
    %cst = arith.constant dense<0.000000e+00> : vector<8x128xf32>
    %2 = tpu.matmul %0, %1, %cst {dimension_numbers = #tpu.dot_dimension_numbers<[1], [0], [0], [1], [0, 0, 1, 1], [], []>} : vector<8x256xf32>, vector<256x128xf32>, vector<8x128xf32> -> vector<8x128xf32>
    %c0_3 = arith.constant 0 : index
    %c0_4 = arith.constant 0 : index
    %3 = vector.load %arg3[%c0_3, %c0_4] : memref<1x128xf32, #tpu.memory_space<vmem>>, vector<1x128xf32>
    %4 = vector.broadcast %3 : vector<1x128xf32> to vector<8x128xf32>
    %5 = arith.addf %2, %4 : vector<8x128xf32>
    %c0_5 = arith.constant 0 : index
    %c0_6 = arith.constant 0 : index
    %6 = vector.load %arg4[%c0_5, %c0_6] : memref<8x128xf32, #tpu.memory_space<vmem>>, vector<8x128xf32>
    tpu.vector_store %arg4[%c0_5, %c0_6], %5 {strides = array<i32>} : memref<8x128xf32, #tpu.memory_space<vmem>>, vector<8x128xf32>,
    return
  }
  func.func @transform_0(%arg0: i32) -> (i32, i32) {
    %c0_i32 = arith.constant 0 : i32
    %c0_i32_0 = arith.constant 0 : i32
    return %arg0, %c0_i32 : i32, i32
  }
  func.func @transform_1(%arg0: i32) -> (i32, i32) {
    %c0_i32 = arith.constant 0 : i32
    %c0_i32_0 = arith.constant 0 : i32
    %c0_i32_1 = arith.constant 0 : i32
    return %c0_i32, %c0_i32_0 : i32, i32
  }
  func.func @transform_2(%arg0: i32) -> (i32, i32) {
    %c0_i32 = arith.constant 0 : i32
    %c0_i32_0 = arith.constant 0 : i32
    %c0_i32_1 = arith.constant 0 : i32
    return %c0_i32, %c0_i32_0 : i32, i32
  }
  func.func @transform_3(%arg0: i32) -> (i32, i32) {
    %c0_i32 = arith.constant 0 : i32
    %c0_i32_0 = arith.constant 0 : i32
    return %arg0, %c0_i32 : i32, i32
  }
}

</mosaic_0001>

<bundles_post_ra>
// kernel: tpu_custom_call.1
= control target key start
LH: loop header
LB: loop body
LE: loop exit
PB: predicated region body
PF: predicated region fallthrough
CT: control target
= control target key end

     0   :  { %8 = vsyncpa [#allocation3], 0  ;;  %s263_s0 = inlined_call_operand.hbm [shape: f32[8,256], index: 0, kind: input, shape index: {}]   ;;  %s264_s1 = inlined_call_operand.hbm [shape: f32[256,128], index: 1, kind: input, shape index: {}]   ;;  %s265_s2 = inlined_call_operand.vmem [shape: f32[1,128], index: 2, kind: input, shape index: {}]   ;;  %s266_s3 = inlined_call_operand.hbm [shape: f32[8,128], index: 3, kind: output, shape index: {}]  }
   0x1   :  { %9 = vsyncpa [#allocation6], 0 }
   0x2   :  { %10 = vsyncpa [#allocation4], 0  ;;  %s16_s14 = sshll.u32 %s263_s0, 4  ;;  %s226_s15 = smov [#allocation2]   ;;  %s17_s14 = int_to_ptr.hbm [resolvable:$true] %s16_s14 }
   0x3   :  { %s18_s16 = sshll.u32 %s226_s15, 4  ;;  %s26_s19 = sshll.u32 %s264_s1, 4  ;;  %s19_s16 = int_to_ptr.vmem [resolvable:$true] %s18_s16  ;;  %s27_s19 = int_to_ptr.hbm [resolvable:$true] %s26_s19 }
   0x4   :  { %21 = dma.hbm_to_vmem [thread:$0]  %s17_s14, 256, %s19_s16, [#allocation3]  }
   0x5   :  { %s227_s20 = smov [#allocation5]   ;;  %s228_s22 = smov 128  }
   0x6   :  { %s28_s21 = sshll.u32 %s227_s20, 4  ;;  %s229_s23 = smov 8   ;;  %s29_s21 = int_to_ptr.vmem [resolvable:$true] %s28_s21 }
   0x7   :  { %34 = dma.hbm_to_vmem [thread:$0]  %s27_s19, 4096, %s29_s21, [#allocation6], %s228_s22, %s228_s22, %s229_s23  }
   0x8   :  { %220 = dma.done.wait [#allocation3], 256  }
   0x9   :  { %221 = vsyncadd [#allocation3], 4294967040 }
   0xa   :  { %222 = dma.done.wait [#allocation6], 4096  }
   0xb   :  { %223 = vsyncadd [#allocation6], 4294963200  ;;  %v62_v0 = vld [vmem:[#allocation5 + $0x78] sm:$0xff]  ;;  %v61_v1 = vld [vmem:[#allocation5 + $0x70] sm:$0xff]  ;;  %s230_s24 = smov [#allocation7]   ;;  %s131_s28 = sshll.u32 %s266_s3, 4  ;;  %s132_s28 = int_to_ptr.hbm [resolvable:$true] %s131_s28 }
   0xc   :  { %v78_v2 = vld [vmem:[#allocation5 + $0xf8] sm:$0xff]  ;;  %83 = vmatpush.msra.mxu0 %v62_v0  ;;  %v77_v3 = vld [vmem:[#allocation5 + $0xf0] sm:$0xff]  ;;  %v60_v4 = vld [vmem:[#allocation5 + $0x68] sm:$0xff]  ;;  %s129_s25 = sshll.u32 %s230_s24, 4  ;;  %s130_s25 = int_to_ptr.vmem [resolvable:$true] %s129_s25 }
   0xd   :  { %103 = vmatpush.msra.mxu1 %v78_v2  ;;  %v76_v5 = vld [vmem:[#allocation5 + $0xe8] sm:$0xff]  ;;  %v59_v6 = vld [vmem:[#allocation5 + $0x60] sm:$0xff]  ;;  %v58_v8 = vld [vmem:[#allocation5 + $0x58] sm:$0xff] }
   0xe   :  { %84 = vmatpush.msra.mxu0 %v61_v1  ;;  %v75_v7 = vld [vmem:[#allocation5 + $0xe0] sm:$0xff]  ;;  %v74_v9 = vld [vmem:[#allocation5 + $0xd8] sm:$0xff]  ;;  %v57_v10 = vld [vmem:[#allocation5 + $0x50] sm:$0xff] }
   0xf   :  { %104 = vmatpush.msra.mxu1 %v77_v3  ;;  %v73_v11 = vld [vmem:[#allocation5 + $0xd0] sm:$0xff]  ;;  %v56_v12 = vld [vmem:[#allocation5 + $0x48] sm:$0xff]  ;;  %v55_v14 = vld [vmem:[#allocation5 + $0x40] sm:$0xff] }
  0x10   :  { %85 = vmatpush.msra.mxu0 %v60_v4  ;;  %v72_v13 = vld [vmem:[#allocation5 + $0xc8] sm:$0xff]  ;;  %v71_v15 = vld [vmem:[#allocation5 + $0xc0] sm:$0xff]  ;;  %v54_v16 = vld [vmem:[#allocation5 + $0x38] sm:$0xff] }
  0x11   :  { %105 = vmatpush.msra.mxu1 %v76_v5  ;;  %v70_v17 = vld [vmem:[#allocation5 + $0xb8] sm:$0xff]  ;;  %v53_v18 = vld [vmem:[#allocation5 + $0x30] sm:$0xff]  ;;  %v52_v20 = vld [vmem:[#allocation5 + $0x28] sm:$0xff] }
  0x12   :  { %86 = vmatpush.msra.mxu0 %v59_v6  ;;  %v69_v19 = vld [vmem:[#allocation5 + $0xb0] sm:$0xff]  ;;  %v68_v21 = vld [vmem:[#allocation5 + $0xa8] sm:$0xff]  ;;  %v51_v22 = vld [vmem:[#allocation5 + $0x20] sm:$0xff] }
  0x13   :  { %106 = vmatpush.msra.mxu1 %v75_v7  ;;  %v67_v23 = vld [vmem:[#allocation5 + $0xa0] sm:$0xff]  ;;  %v50_v24 = vld [vmem:[#allocation5 + $0x18] sm:$0xff]  ;;  %v49_v26 = vld [vmem:[#allocation5 + $0x10] sm:$0xff] }
  0x14   :  { %87 = vmatpush.msra.mxu0 %v58_v8  ;;  %v66_v25 = vld [vmem:[#allocation5 + $0x98] sm:$0xff]  ;;  %v65_v27 = vld [vmem:[#allocation5 + $0x90] sm:$0xff]  ;;  %v48_v28 = vld [vmem:[#allocation5 + $0x8] sm:$0xff] }
  0x15   :  { %107 = vmatpush.msra.mxu1 %v74_v9  ;;  %v64_v29 = vld [vmem:[#allocation5 + $0x88] sm:$0xff]  ;;  %v47_v30 = vld [vmem:[#allocation5] sm:$0xff]  ;;  %v45_v32 = vld [vmem:[#allocation2] sm:$0xff] }
  0x16   :  { %88 = vmatpush.msra.mxu0 %v57_v10  ;;  %v63_v31 = vld [vmem:[#allocation5 + $0x80] sm:$0xff]  ;;  %v46_v33 = vld [vmem:[#allocation2 + $0x8] sm:$0xff]  ;;  %v147_v34 = vld [vmem:[%s265_s2] ss:$0 sm:$0xff] }
  0x17   :  { %108 = vmatpush.msra.mxu1 %v73_v11 }
  0x18   :  { %89 = vmatpush.msra.mxu0 %v56_v12 }
  0x19   :  { %109 = vmatpush.msra.mxu1 %v72_v13 }
  0x1a   :  { %90 = vmatpush.msra.mxu0 %v55_v14 }
  0x1b   :  { %110 = vmatpush.msra.mxu1 %v71_v15 }
  0x1c   :  { %91 = vmatpush.msra.mxu0 %v54_v16 }
  0x1d   :  { %111 = vmatpush.msra.mxu1 %v70_v17 }
  0x1e   :  { %92 = vmatpush.msra.mxu0 %v53_v18 }
  0x1f   :  { %112 = vmatpush.msra.mxu1 %v69_v19 }
  0x20   :  { %93 = vmatpush.msra.mxu0 %v52_v20 }
  0x21   :  { %113 = vmatpush.msra.mxu1 %v68_v21 }
  0x22   :  { %94 = vmatpush.msra.mxu0 %v51_v22 }
  0x23   :  { %114 = vmatpush.msra.mxu1 %v67_v23 }
  0x24   :  { %95 = vmatpush.msra.mxu0 %v50_v24 }
  0x25   :  { %115 = vmatpush.msra.mxu1 %v66_v25 }
  0x26   :  { %96 = vmatpush.msra.mxu0 %v49_v26 }
  0x27   :  { %116 = vmatpush.msra.mxu1 %v65_v27 }
  0x28   :  { %97 = vmatpush.msra.mxu0 %v48_v28 }
  0x29   :  { %117 = vmatpush.msra.mxu1 %v64_v29 }
  0x2a   :  { %98 = vmatpush.msra.mxu0 %v47_v30 }
  0x2b   :  { %118 = vmatpush.msra.mxu1 %v63_v31  ;;  %99 = vmatmul.f32.vlgmr.msra.gmra.mxu0 %v45_v32 }
  0x2c   :  { %119 = vmatmul.f32.vlgmr.msra.gmra.mxu1 %v46_v33 }
  0xa8   :  { %v100_v35 = vpop.f32.mrf.mxu0 }
  0xa9   :  { %v120_v36 = vpop.f32.mrf.mxu1  ;;  %v101_v37 = vadd.f32 %v147_v34, %v100_v35 }
  0xab   :  { %v121_v38 = vadd.f32 %v120_v36, %v101_v37 }
  0xad   :  { %123 = vst [vmem:[#allocation7] sm:$0xff] %v121_v38 }
  0xae   :  { %134 = dma.vmem_to_hbm [thread:$0]  %s130_s25, 128, %s132_s28, [#allocation4]  }
  0xaf   :  { %224 = dma.done.wait [#allocation4], 128  }
  0xb0   :  { %225 = vsyncadd [#allocation4], 4294967168 }
  0xb1   :  { %139 = vsyncpa [#allocation3], 1 }
  0xb2   :  { %140 = vsyncpa [#allocation6], 1 }
  0xb3   :  { %141 = vsyncpa [#allocation4], 1 }

</bundles_post_ra>
